<compile_context>
chip_gen: v7x
topology: tpu7x:2x2x1
jax: 0.10.0
libtpu: 0.0.40
codegen_flags: <defaults>
</compile_context>

<pallas_src>
import functools

import jax
import jax.numpy as jnp
from jax import lax
from jax.experimental import pallas as pl
from jax.experimental.pallas import tpu as pltpu

_EPS = 1e-12


def _round_up(x: int, m: int) -> int:
    return ((x + m - 1) // m) * m


def _row_mask(tb: int, b_total: int):
    """(TB, 1) bool mask: True for rows that belong to the real (unpadded) batch."""
    row0 = pl.program_id(0) * tb
    rows = row0 + lax.broadcasted_iota(jnp.int32, (tb, 1), 0)
    return rows < b_total


def bhat_onehot_kernel(x_ref, t_ref, o_ref, *, b_total: int):
    # x_ref: (TB, C) logits (native dtype); t_ref: (TB, 1) int32 class ids;
    # o_ref: (1, 1, 1) f32 per-tile partial sum of -log(bc + eps).
    x = x_ref[...].astype(jnp.float32)
    t = t_ref[...]
    tb, c = x.shape

    m = jnp.max(x, axis=-1, keepdims=True)
    e = jnp.exp(x - m)
    sum_e = jnp.sum(e, axis=-1, keepdims=True)                      # (TB, 1)

    # one_hot_v2: eye(nb_classes).index_select(0, target)  ==  (iota == target)
    classes = lax.broadcasted_iota(jnp.int32, (tb, c), 1)
    e_t = jnp.sum(jnp.where(classes == t, e, 0.0), axis=-1, keepdims=True)

    # one-hot target  =>  sum_c sqrt(p * onehot) == sqrt(p_target)
    # (identical to the reference formula; eps is still added after the sqrt-sum)
    bc = jnp.sqrt(e_t) * lax.rsqrt(sum_e)                            # (TB, 1)
    per_example = -jnp.log(bc + _EPS)

    per_example = jnp.where(_row_mask(tb, b_total), per_example, 0.0)
    o_ref[...] = jnp.sum(per_example, axis=0, keepdims=True).reshape(1, 1, 1)


def bhat_wasser_kernel(x_ref, t_ref, o_ref, *, b_total: int):
    # wasser_coonv: target1 = 2*target - 1 (dense (TB, C) target), same loss.
    # NB: target1 < 0 makes sqrt produce NaN — faithful to the torch original.
    x = x_ref[...].astype(jnp.float32)
    t1 = 2.0 * t_ref[...].astype(jnp.float32) - 1.0
    tb, _ = x.shape

    m = jnp.max(x, axis=-1, keepdims=True)
    e = jnp.exp(x - m)
    sum_e = jnp.sum(e, axis=-1, keepdims=True)

    # sum_c sqrt(softmax(x)_c * t1_c) == rsqrt(sum_e) * sum_c sqrt(e_c * t1_c)
    # -> B*C divides replaced by one rsqrt per row (EUP slot, effectively free).
    bc = lax.rsqrt(sum_e) * jnp.sum(jnp.sqrt(e * t1), axis=-1, keepdims=True)
    per_example = -jnp.log(bc + _EPS)

    per_example = jnp.where(_row_mask(tb, b_total), per_example, 0.0)
    o_ref[...] = jnp.sum(per_example, axis=0, keepdims=True).reshape(1, 1, 1)


class BhatPallas:
    """JAX/Pallas analogue of `bhat(func0, targ_mode, device, nb_classes)`."""

    def __init__(self, targ_mode: int, nb_classes: int, tile_b: int | None = None):
        self.one_hot_flag = targ_mode
        self.nb_classes = nb_classes
        self.tile_b = tile_b  # optional override (mostly for testing the grid path)
        # torch.sparse eye + index_select is realized in-kernel via iota==label.

    def _pick_tb(self, b: int, c: int, itemsize: int) -> int:
        # Sublane packing granularity: 8 rows (f32), 16 (bf16), 32 (int8/fp8).
        sub = max(8, 32 // itemsize)
        if self.tile_b is not None:
            return _round_up(self.tile_b, sub)
        # ~4 MiB per input buffer; double-buffered (and with a same-sized dense
        # target block in the wasser branch) this stays well under the scoped
        # VMEM budget on every generation, including v7x's 64 MiB.
        per_buf_bytes = 4 * 1024 * 1024
        tb = per_buf_bytes // max(1, c * itemsize)
        tb = max(sub, min(2048, tb))
        tb = min(tb, _round_up(b, sub))
        return _round_up(tb, sub)

    def __call__(self, inp, target):
        b, c = inp.shape
        assert c == self.nb_classes

        one_hot = self.one_hot_flag < 3
        if one_hot:
            # (B, 1) int32 class ids; lane-padded in VMEM but tiled with the
            # logits so the footprint stays negligible.
            # TODO(synk): for huge B the ids could ride in via scalar prefetch.
            t2 = target.astype(jnp.int32).reshape(b, 1)
        else:
            t2 = target.reshape(b, c)  # keep native dtype; cast inside kernel

        itemsize = jnp.dtype(inp.dtype).itemsize
        tb = self._pick_tb(b, c, itemsize)
        num_tiles = pl.cdiv(b, tb)
        b_pad = num_tiles * tb

        if b_pad != b:
            inp = jnp.pad(inp, ((0, b_pad - b), (0, 0)))
            t2 = jnp.pad(t2, ((0, b_pad - b), (0, 0)))

        if one_hot:
            kernel = functools.partial(bhat_onehot_kernel, b_total=b)
            t_spec = pl.BlockSpec((tb, 1), lambda i: (i, 0))
            t_bytes = b_pad * 4
        else:
            kernel = functools.partial(bhat_wasser_kernel, b_total=b)
            t_spec = pl.BlockSpec((tb, c), lambda i: (i, 0))
            t_bytes = b_pad * c * jnp.dtype(t2.dtype).itemsize

        cost = pl.CostEstimate(
            flops=8 * b_pad * c,
            transcendentals=b_pad * c + 3 * b_pad,   # exp per element; log/sqrt/rsqrt per row
            bytes_accessed=b_pad * c * itemsize + t_bytes + num_tiles * 4,
        )

        partials = pl.pallas_call(
            kernel,
            out_shape=jax.ShapeDtypeStruct((num_tiles, 1, 1), jnp.float32),
            grid=(num_tiles,),
            in_specs=[
                pl.BlockSpec((tb, c), lambda i: (i, 0)),
                t_spec,
            ],
            out_specs=pl.BlockSpec((1, 1, 1), lambda i: (i, 0, 0)),
            compiler_params=pltpu.CompilerParams(
                dimension_semantics=("parallel",),          # shards tiles across TCs on v7x
                vmem_limit_bytes=32 * 1024 * 1024,
            ),
            cost_estimate=cost,
        )(inp, t2)

        # Tiny final reduction over (num_tiles,) partial sums in plain JAX.
        return jnp.sum(partials) / b


if __name__ == "__main__":
    key = jax.random.PRNGKey(0)
    B, C = 8, 16
    kx, kt, kw = jax.random.split(key, 3)
    x = jax.random.normal(kx, (B, C), dtype=jnp.float32)
    target = jax.random.randint(kt, (B,), 0, C, dtype=jnp.int32)

    def ref_onehot(xv, tv, nc):
        p = jax.nn.softmax(xv.astype(jnp.float32), axis=-1)
        oh = jax.nn.one_hot(tv, nc, dtype=jnp.float32)
        return jnp.mean(-jnp.log(jnp.sum(jnp.sqrt(p * oh), axis=-1) + _EPS))

    # --- targ_mode=0 (<3): one-hot label processing, f32 logits
    mod = BhatPallas(targ_mode=0, nb_classes=C)
    loss = mod(x, target)
    jax.block_until_ready(loss)
    assert jnp.allclose(loss, ref_onehot(x, target, C), atol=1e-5, rtol=1e-5), (
        float(loss), float(ref_onehot(x, target, C)))

    # --- same path with bf16 logits shipped natively (no wrapper upcast)
    x_bf16 = x.astype(jnp.bfloat16)
    loss_bf16 = mod(x_bf16, target)
    jax.block_until_ready(loss_bf16)
    assert jnp.allclose(loss_bf16, ref_onehot(x_bf16, target, C), atol=1e-4, rtol=1e-4)

    # --- multi-tile + ragged batch: exercises the grid, padding and row masking
    B2 = 20
    x2 = jax.random.normal(kw, (B2, C), dtype=jnp.float32)
    tgt2 = jax.random.randint(kt, (B2,), 0, C, dtype=jnp.int32)
    mod_tiled = BhatPallas(targ_mode=0, nb_classes=C, tile_b=8)   # 3 tiles, last one padded
    loss2 = mod_tiled(x2, tgt2)
    jax.block_until_ready(loss2)
    assert jnp.allclose(loss2, ref_onehot(x2, tgt2, C), atol=1e-5, rtol=1e-5)

    # --- targ_mode=3 (>=3): wasser_coonv dense targets (kept in [0.5, 1] so 2t-1 >= 0)
    tw = jax.random.uniform(kw, (B, C), dtype=jnp.float32, minval=0.5, maxval=1.0)
    mod_w = BhatPallas(targ_mode=3, nb_classes=C)
    loss_w = mod_w(x, tw)
    jax.block_until_ready(loss_w)
    p = jax.nn.softmax(x, axis=-1)
    ref_w = jnp.mean(-jnp.log(jnp.sum(jnp.sqrt(p * (2.0 * tw - 1.0)), axis=-1) + _EPS))
    assert jnp.allclose(loss_w, ref_w, atol=1e-5, rtol=1e-5), (float(loss_w), float(ref_w))

    print("KERNEL_OK")
</pallas_src>

<mosaic_0001>
module attributes {stable_mosaic.version = 11 : i64} {
  func.func @bhat_onehot_kernel(%arg0: i32, %arg1: memref<8x16xf32, #tpu.memory_space<vmem>>, %arg2: memref<8x1xi32, #tpu.memory_space<vmem>>, %arg3: memref<1x1x1xf32, #tpu.memory_space<vmem>>) attributes {dimension_semantics = [#tpu.dimension_semantics<parallel>], iteration_bounds = array<i64: 1>, scalar_prefetch = 0 : i64, scratch_operands = 0 : i64, tpu.core_type = #tpu.core_type<tc>, window_params = [{transform_indices = @transform_0, window_bounds = array<i64: 8, 16>}, {transform_indices = @transform_1, window_bounds = array<i64: 8, 1>}, {transform_indices = @transform_2, window_bounds = array<i64: 1, 1, 1>}]} {
    %c0 = arith.constant 0 : index
    %c0_0 = arith.constant 0 : index
    %0 = vector.load %arg1[%c0, %c0_0] : memref<8x16xf32, #tpu.memory_space<vmem>>, vector<8x16xf32>
    %c0_1 = arith.constant 0 : index
    %c0_2 = arith.constant 0 : index
    %1 = vector.load %arg2[%c0_1, %c0_2] : memref<8x1xi32, #tpu.memory_space<vmem>>, vector<8x1xi32>
    %cst = arith.constant dense<0xFF800000> : vector<8xf32>
    %2 = vector.multi_reduction <maximumf>, %0, %cst [1] : vector<8x16xf32> to vector<8xf32>
    %3 = vector.shape_cast %2 : vector<8xf32> to vector<8x1xf32>
    %4 = vector.broadcast %3 : vector<8x1xf32> to vector<8x16xf32>
    %5 = arith.subf %0, %4 : vector<8x16xf32>
    %6 = math.exp %5 : vector<8x16xf32>
    %cst_3 = arith.constant dense<0.000000e+00> : vector<8xf32>
    %7 = vector.multi_reduction <add>, %6, %cst_3 [1] : vector<8x16xf32> to vector<8xf32>
    %8 = vector.shape_cast %7 : vector<8xf32> to vector<8x1xf32>
    %9 = tpu.iota {dimensions = array<i32: 1>} : vector<8x16xi32>
    %10 = vector.broadcast %1 : vector<8x1xi32> to vector<8x16xi32>
    %11 = arith.cmpi eq, %9, %10 : vector<8x16xi32>
    %cst_4 = arith.constant 0.000000e+00 : f32
    %12 = vector.broadcast %cst_4 : f32 to vector<8x16xf32>
    %13 = arith.select %11, %6, %12 : vector<8x16xi1>, vector<8x16xf32>
    %cst_5 = arith.constant dense<0.000000e+00> : vector<8xf32>
    %14 = vector.multi_reduction <add>, %13, %cst_5 [1] : vector<8x16xf32> to vector<8xf32>
    %15 = vector.shape_cast %14 : vector<8xf32> to vector<8x1xf32>
    %16 = math.sqrt %15 : vector<8x1xf32>
    %17 = math.rsqrt %8 : vector<8x1xf32>
    %18 = arith.mulf %16, %17 : vector<8x1xf32>
    %cst_6 = arith.constant 9.99999996E-13 : f32
    %19 = vector.broadcast %cst_6 : f32 to vector<8x1xf32>
    %20 = arith.addf %18, %19 : vector<8x1xf32>
    %21 = math.log %20 : vector<8x1xf32>
    %cst_7 = arith.constant 0.000000e+00 : f32
    %22 = vector.broadcast %cst_7 : f32 to vector<8x1xf32>
    %23 = arith.subf %22, %21 : vector<8x1xf32>
    %c8_i32 = arith.constant 8 : i32
    %24 = arith.muli %arg0, %c8_i32 : i32
    %25 = tpu.iota {dimensions = array<i32: 0>} : vector<8x1xi32>
    %26 = vector.broadcast %24 : i32 to vector<8x1xi32>
    %27 = arith.addi %26, %25 : vector<8x1xi32>
    %c8_i32_8 = arith.constant 8 : i32
    %28 = vector.broadcast %c8_i32_8 : i32 to vector<8x1xi32>
    %29 = arith.cmpi slt, %27, %28 : vector<8x1xi32>
    %cst_9 = arith.constant 0.000000e+00 : f32
    %30 = vector.broadcast %cst_9 : f32 to vector<8x1xf32>
    %31 = arith.select %29, %23, %30 : vector<8x1xi1>, vector<8x1xf32>
    %cst_10 = arith.constant dense<0.000000e+00> : vector<1xf32>
    %32 = vector.multi_reduction <add>, %31, %cst_10 [0] : vector<8x1xf32> to vector<1xf32>
    %33 = vector.shape_cast %32 : vector<1xf32> to vector<1x1xf32>
    %34 = vector.shape_cast %33 : vector<1x1xf32> to vector<1x1x1xf32>
    %c0_11 = arith.constant 0 : index
    %c0_12 = arith.constant 0 : index
    %c0_13 = arith.constant 0 : index
    %35 = vector.load %arg3[%c0_11, %c0_12, %c0_13] : memref<1x1x1xf32, #tpu.memory_space<vmem>>, vector<1x1x1xf32>
    tpu.vector_store %arg3[%c0_11, %c0_12, %c0_13], %34 {strides = array<i32>} : memref<1x1x1xf32, #tpu.memory_space<vmem>>, vector<1x1x1xf32>,
    return
  }
  func.func @transform_0(%arg0: i32) -> (i32, i32) {
    %c0_i32 = arith.constant 0 : i32
    %c0_i32_0 = arith.constant 0 : i32
    return %arg0, %c0_i32 : i32, i32
  }
  func.func @transform_1(%arg0: i32) -> (i32, i32) {
    %c0_i32 = arith.constant 0 : i32
    %c0_i32_0 = arith.constant 0 : i32
    return %arg0, %c0_i32 : i32, i32
  }
  func.func @transform_2(%arg0: i32) -> (i32, i32, i32) {
    %c0_i32 = arith.constant 0 : i32
    %c0_i32_0 = arith.constant 0 : i32
    %c0_i32_1 = arith.constant 0 : i32
    return %arg0, %c0_i32, %c0_i32_0 : i32, i32, i32
  }
}

</mosaic_0001>

<bundles_post_ra>
// kernel: tpu_custom_call.1
= control target key start
LH: loop header
LB: loop body
LE: loop exit
PB: predicated region body
PF: predicated region fallthrough
CT: control target
= control target key end

     0   :  { %vm14_vm0 = vcmask 130048   ;;  %s149_s0 = inlined_call_operand.vmem [shape: f32[8,16], index: 0, kind: input, shape index: {}]   ;;  %s150_s1 = inlined_call_operand.vmem [shape: s32[8,1], index: 1, kind: input, shape index: {}]   ;;  %s151_s2 = inlined_call_operand.hbm [shape: f32[1,1,1], index: 2, kind: output, shape index: {}]  }
   0x1   :  { %v12_v0 = vld [vmem:[%s149_s0] sm:$0xff] }
   0x2   :  { %7 = vsyncpa [#allocation3], 0  ;;  %v15_v1 = vsel %vm14_vm0, %v12_v0, -inf  ;;  %v111_v2 = vmov 0   ;;  %v13_v3 = vld [vmem:[%s150_s1] sm:$0xff]  ;;  %v24_v7 = vlaneseq  ;;  %s112_s0 = smov [#allocation2]  }
   0x3   :  { %78 = vset.pattern.permute.xlu0 %v111_v2  ;;  %s68_s1 = sshll.u32 %s112_s0, 4  ;;  %vm60_vm4 = vcmask 0   ;;  %s69_s1 = int_to_ptr.vmem [resolvable:$true] %s68_s1 }
   0x4   :  { %16 = vmax.xlane.f32.xlu0 %v15_v1  ;;  %v25_v8 = vand.u32 127, %v24_v7  ;;  %s87_s13 = scalar_lea.vmem %s69_s1, 16  ;;  %s91_s14 = scalar_lea.vmem %s69_s1, 32 }
   0x5   :  { %p88_p0 = scmp.ne.s32.totalorder %s69_s1, %s87_s13  ;;  %p92_p1 = scmp.lt.s32.totalorder %s69_s1, %s69_s1 }
   0x6   :  { %p93_p2 = scmp.lt.s32.totalorder %s91_s14, %s87_s13 }
   0x8   :  { %p94_p3 = por %p93_p2, %p92_p1 }
   0xa   :  { %p95_p4 = pnand %p94_p3, %p88_p0 }
  0x1a   :  { %27 = vperm.xlu0 %78, %v13_v3  }
  0x91   :  { %v17_v4 = vpop.xlane.xlu0 %16 }
  0x92   :  { %v18_v5 = vsub.f32 %v12_v0, %v17_v4 }
  0x94   :  { %v19_v6 = vmul.f32 1.442695, %v18_v5 }
  0x96   :  { %79 = vpow2.f32 %v19_v6 }
  0x99   :  { %v28_v9 = vpop.permute.xlu0 %27 }
  0x9a   :  { %vm29_vm1 = vcmp.eq.s32.totalorder %v25_v8, %v28_v9 }
  0xa0   :  { %v80_v10 = vpop.eup %79 }
  0xa1   :  { %v30_v11 = vsel %vm29_vm1, %v80_v10, 0.0  ;;  %v21_v13 = vsel %vm14_vm0, %v80_v10, 0.0 }
  0xa2   :  { %v31_v12 = vsel %vm14_vm0, %v30_v11, 0.0 }
  0xa3   :  { %32 = vadd.xlane.f32.xlu1 %v31_v12 }
  0xa7   :  { %22 = vadd.xlane.f32.xlu1 %v21_v13 }
 0x130   :  { %v33_v14 = vpop.xlane.xlu1 %32 }
 0x131   :  { %81 = vrsqrt.f32 %v33_v14  ;;  %vm36_vm2 = vcmp.eq.f32.partialorder %v33_v14, inf  ;;  %v39_v18 = vand.u32 2147483648, %v33_v14  ;;  %vm38_vm3 = vcmp.eq.f32.partialorder %v33_v14, 0.0 }
 0x134   :  { %v23_v15 = vpop.xlane.xlu1 %22 }
 0x135   :  { %83 = vrsqrt.f32 %v23_v15 }
 0x13b   :  { %v82_v16 = vpop.eup %81 }
 0x13c   :  { %v35_v17 = vmul.f32 %v82_v16, %v33_v14 }
 0x13e   :  { %v37_v19 = vsel %vm36_vm2, %v33_v14, %v35_v17 }
 0x13f   :  { %v84_v20 = vpop.eup %83  ;;  %v40_v21 = vsel %vm38_vm3, %v39_v18, %v37_v19 }
 0x140   :  { %v42_v22 = vmul.f32 %v84_v20, %v40_v21 }
 0x142   :  { %v43_v23 = vadd.f32 1e-12, %v42_v22 }
 0x144   :  { %85 = vlog2.f32 %v43_v23 }
 0x14e   :  { %v86_v24 = vpop.eup %85 }
 0x14f   :  { %v45_v25 = vmul.f32 0.6931472, %v86_v24 }
 0x151   :  { %v46_v26 = vsub.f32 0.0, %v45_v25 }
 0x153   :  { %v54_v27 = vrot.slane %v46_v26, 4 }
 0x155   :  { %v55_v28 = vadd.f32 %v54_v27, %v46_v26 }
 0x157   :  { %v56_v29 = vrot.slane %v55_v28, 2 }
 0x159   :  { %v57_v30 = vadd.f32 %v56_v29, %v55_v28 }
 0x15b   :  { %v58_v31 = vrot.slane %v57_v30, 1 }
 0x15d   :  { %v59_v32 = vadd.f32 %v58_v31, %v57_v30 }
 0x15f   :  { %61 = vst.msk [vmem:[#allocation2] sm:$0x1] %vm60_vm4, %v59_v32 }
 0x160   :  { %98 = shalt.err (!%p95_p4)
}
 0x161   :  { %s99_s17 = scalar_lea.hbm %s151_s2, 16 }
 0x162   :  { %p100_p5 = scmp.ne.s32.totalorder %s151_s2, %s99_s17  ;;  %p103_p6 = scmp.lt.u32.totalorder %s99_s17, %s151_s2 }
 0x164   :  { %p105_p7 = pnand %p103_p6, %p100_p5 }
 0x166   :  { %108 = shalt.err (!%p105_p7)
}
 0x167   :  { %71 = dma.vmem_to_hbm [thread:$0]  %s69_s1, 16, %s151_s2, [#allocation3]  }
 0x168   :  { %109 = dma.done.wait [#allocation3], 16  }
 0x169   :  { %110 = vsyncadd [#allocation3], 4294967280 }
 0x16a   :  { %75 = vsyncpa [#allocation3], 1 }

</bundles_post_ra>
